<compile_context>
chip_gen: v7x
topology: tpu7x:2x2x1
jax: 0.10.0
libtpu: 0.0.40
codegen_flags: <defaults>
</compile_context>

<pallas_src>
import jax
import jax.numpy as jnp
from jax.experimental import pallas as pl
from jax.experimental.pallas import tpu as pltpu


def _bias_kernel(bias_ref, img_ref, snd_ref, out_ref):
    # bias_ref: SMEM (1,)          learnable scalar bias
    # img_ref:  VMEM (Bt, C)       batch tile of feat_img
    # snd_ref:  VMEM (Bt, C, HWt)  batch x spatial tile of feat_sound
    # out_ref:  VMEM (Bt, HWt)     dense output tile
    b = bias_ref[0]                                # hoist scalar read
    img = img_ref[...]                             # (Bt, C)
    snd = snd_ref[...]                             # (Bt, C, HWt)
    # VPU broadcast-multiply, then reduce over C (second-to-minor axis).
    z = jnp.sum(img[:, :, None] * snd, axis=1)     # (Bt, HWt) f32
    out_ref[...] = (z + b).astype(out_ref.dtype)


def _pick_tiles(B, C, HW):
    """Pick (Bt, HWt): sublane-dense batch tile, 128-multiple lane tile, with
    double-buffered sound blocks kept <= ~16 MiB (safe on v5e/v6e/v7x)."""
    # Batch tile: multiple of 8 for dense sublane stores when B allows it.
    if B <= 8:
        Bt = B
    else:
        Bt = max(8, min(64, (B // 8) * 8))
    # HW tile: multiple of 128; cap so one sound block <= ~8 MiB
    # (x2 double buffering -> <= ~16 MiB total for the dominant stream).
    snd_block_budget = 8 * 1024 * 1024
    max_hw = snd_block_budget // max(1, Bt * C * 4)
    if HW <= 128:
        HWt = HW                                   # full-dim block is legal
    else:
        cap = max(128, min(4096, (max_hw // 128) * 128))
        HWt = HW if cap >= HW else cap
    return Bt, HWt


def bias_forward(feat_img, feat_sound, bias):
    """feat_img: (B, C), feat_sound: (B, C, H, W), bias: (1,).
    Returns (B, 1, H, W) float32, matching PyTorch Bias.forward."""
    B, C, H, W = feat_sound.shape
    HW = H * W
    Bt, HWt = _pick_tiles(B, C, HW)

    img2 = feat_img.astype(jnp.float32)                       # (B, C)
    snd3 = feat_sound.reshape(B, C, HW).astype(jnp.float32)   # (B, C, HW)
    bias = bias.astype(jnp.float32)

    grid = (pl.cdiv(B, Bt), pl.cdiv(HW, HWt))

    out2 = pl.pallas_call(
        _bias_kernel,
        out_shape=jax.ShapeDtypeStruct((B, HW), jnp.float32),
        grid_spec=pltpu.PrefetchScalarGridSpec(
            num_scalar_prefetch=0,
            grid=grid,
            in_specs=[
                pl.BlockSpec(memory_space=pltpu.SMEM),               # bias scalar
                pl.BlockSpec((Bt, C), lambda i, j: (i, 0)),          # feat_img tile
                pl.BlockSpec((Bt, C, HWt), lambda i, j: (i, 0, j)),  # feat_sound tile
            ],
            out_specs=pl.BlockSpec((Bt, HWt), lambda i, j: (i, j)),  # dense 2-D out
        ),
        compiler_params=pltpu.CompilerParams(
            dimension_semantics=("parallel", "parallel"),
            vmem_limit_bytes=48 * 1024 * 1024,
        ),
        cost_estimate=pl.CostEstimate(
            flops=2 * B * C * HW,
            transcendentals=0,
            bytes_accessed=4 * (B * C * HW + B * C + B * HW),
        ),
    )(bias, img2, snd3)

    return out2.reshape(B, 1, H, W)


if __name__ == "__main__":
    key = jax.random.PRNGKey(0)
    k_img, k_snd = jax.random.split(key)

    B, C, H, W = 2, 4, 16, 16
    feat_img = jax.random.normal(k_img, (B, C), dtype=jnp.float32)
    feat_sound = jax.random.normal(k_snd, (B, C, H, W), dtype=jnp.float32)
    # nn.Parameter(torch.zeros(1)) -> deterministic zero init
    bias = jnp.zeros((1,), dtype=jnp.float32)

    out = bias_forward(feat_img, feat_sound, bias)
    jax.block_until_ready(out)

    # Pure-JAX reference check
    ref = jnp.einsum("bc,bchw->bhw", feat_img, feat_sound)[:, None, :, :] + bias[0]
    assert out.shape == (B, 1, H, W)
    assert jnp.allclose(out, ref, atol=1e-5, rtol=1e-5)

    print("KERNEL_OK")
</pallas_src>

<mosaic_0001>
module attributes {stable_mosaic.version = 11 : i64} {
  func.func @_bias_kernel(%arg0: i32, %arg1: i32, %arg2: memref<1xf32, #tpu.memory_space<smem>>, %arg3: memref<2x4xf32, #tpu.memory_space<vmem>>, %arg4: memref<2x4x256xf32, #tpu.memory_space<vmem>>, %arg5: memref<2x256xf32, #tpu.memory_space<vmem>>) attributes {dimension_semantics = [#tpu.dimension_semantics<parallel>, #tpu.dimension_semantics<parallel>], iteration_bounds = array<i64: 1, 1>, scalar_prefetch = 0 : i64, scratch_operands = 0 : i64, tpu.core_type = #tpu.core_type<tc>, window_params = [{transform_indices = @transform_0, window_bounds = array<i64: 1>}, {transform_indices = @transform_1, window_bounds = array<i64: 2, 4>}, {transform_indices = @transform_2, window_bounds = array<i64: 2, 4, 256>}, {transform_indices = @transform_3, window_bounds = array<i64: 2, 256>}]} {
    %c0 = arith.constant 0 : index
    %0 = memref.load %arg2[%c0] : memref<1xf32, #tpu.memory_space<smem>>
    %c0_0 = arith.constant 0 : index
    %c0_1 = arith.constant 0 : index
    %1 = vector.load %arg3[%c0_0, %c0_1] : memref<2x4xf32, #tpu.memory_space<vmem>>, vector<2x4xf32>
    %c0_2 = arith.constant 0 : index
    %c0_3 = arith.constant 0 : index
    %c0_4 = arith.constant 0 : index
    %2 = vector.load %arg4[%c0_2, %c0_3, %c0_4] : memref<2x4x256xf32, #tpu.memory_space<vmem>>, vector<2x4x256xf32>
    %3 = vector.shape_cast %1 : vector<2x4xf32> to vector<2x4x1xf32>
    %4 = vector.broadcast %3 : vector<2x4x1xf32> to vector<2x4x256xf32>
    %5 = arith.mulf %4, %2 : vector<2x4x256xf32>
    %cst = arith.constant dense<0.000000e+00> : vector<2x256xf32>
    %6 = vector.multi_reduction <add>, %5, %cst [1] : vector<2x4x256xf32> to vector<2x256xf32>
    %7 = vector.broadcast %0 : f32 to vector<2x256xf32>
    %8 = arith.addf %6, %7 : vector<2x256xf32>
    %c0_5 = arith.constant 0 : index
    %c0_6 = arith.constant 0 : index
    %9 = vector.load %arg5[%c0_5, %c0_6] : memref<2x256xf32, #tpu.memory_space<vmem>>, vector<2x256xf32>
    tpu.vector_store %arg5[%c0_5, %c0_6], %8 {strides = array<i32>} : memref<2x256xf32, #tpu.memory_space<vmem>>, vector<2x256xf32>,
    return
  }
  func.func @transform_0(%arg0: i32, %arg1: i32) -> i32 {
    %c0_i32 = arith.constant 0 : i32
    %c0_i32_0 = arith.constant 0 : i32
    return %c0_i32 : i32
  }
  func.func @transform_1(%arg0: i32, %arg1: i32) -> (i32, i32) {
    %c0_i32 = arith.constant 0 : i32
    %c0_i32_0 = arith.constant 0 : i32
    return %arg0, %c0_i32 : i32, i32
  }
  func.func @transform_2(%arg0: i32, %arg1: i32) -> (i32, i32, i32) {
    %c0_i32 = arith.constant 0 : i32
    %c0_i32_0 = arith.constant 0 : i32
    return %arg0, %c0_i32, %arg1 : i32, i32, i32
  }
  func.func @transform_3(%arg0: i32, %arg1: i32) -> (i32, i32) {
    %c0_i32 = arith.constant 0 : i32
    return %arg0, %arg1 : i32, i32
  }
}

</mosaic_0001>

<bundles_post_ra>
// kernel: tpu_custom_call.1
= control target key start
LH: loop header
LB: loop body
LE: loop exit
PB: predicated region body
PF: predicated region fallthrough
CT: control target
= control target key end

     0   :  { %9 = vsyncpa [#allocation4], 0  ;;  %s256_s0 = inlined_call_operand.<no memory space> [shape: f32[1], index: 0, kind: input, shape index: {}]   ;;  %s257_s1 = inlined_call_operand.vmem [shape: f32[2,4], index: 1, kind: input, shape index: {}]   ;;  %s258_s2 = inlined_call_operand.hbm [shape: f32[2,4,256], index: 2, kind: input, shape index: {}]   ;;  %s259_s3 = inlined_call_operand.hbm [shape: f32[2,256], index: 3, kind: output, shape index: {}]  }
   0x1   :  { %10 = vsyncpa [#allocation5], 0  ;;  %s197_s12 = smov [#allocation3]   ;;  %s149_s16 = scalar_lea.hbm %s258_s2, 256 }
   0x2   :  { %s20_s13 = sshll.u32 %s197_s12, 4  ;;  %p150_p0 = scmp.ne.s32.totalorder %s258_s2, %s149_s16  ;;  %s21_s13 = int_to_ptr.vmem [resolvable:$true] %s20_s13 }
   0x3   :  { %p153_p1 = scmp.lt.u32.totalorder %s149_s16, %s258_s2 }
   0x5   :  { %p155_p2 = pnand %p153_p1, %p150_p0 }
   0x7   :  { %158 = shalt.err (!%p155_p2)
}
   0x8   :  { %s159_s21 = scalar_lea.vmem %s21_s13, 256  ;;  %p164_p4 = scmp.lt.s32.totalorder %s21_s13, %s21_s13 }
   0x9   :  { %p160_p3 = scmp.ne.s32.totalorder %s21_s13, %s159_s21  ;;  %p165_p5 = scmp.lt.s32.totalorder %s159_s21, %s159_s21 }
   0xb   :  { %p166_p6 = por %p165_p5, %p164_p4 }
   0xd   :  { %p167_p7 = pnand %p166_p6, %p160_p3 }
   0xf   :  { %170 = shalt.err (!%p167_p7)
}
  0x10   :  { %s198_s22 = smov 128   ;;  %s199_s23 = smov 8  }
  0x11   :  { %26 = dma.hbm_to_vmem [thread:$0]  %s258_s2, 256, %s21_s13, [#allocation4], %s198_s22, %s198_s22, %s199_s23  }
  0x12   :  { %193 = dma.done.wait [#allocation4], 256  }
  0x13   :  { %194 = vsyncadd [#allocation4], 4294967040  ;;  %v34_v0 = vlaneseq  ;;  %v31_v4 = vld [vmem:[%s257_s1] sm:$0x3]  ;;  %v33_v7 = vld [vmem:[#allocation3 + $0x8] sm:$0xff]  ;;  %vm58_vm0 = vcmask 1043456   ;;  %v87_v40 = vstv %s256_s0 }
  0x14   :  { %v51_v8 = vcombine.high %v33_v7, %v33_v7  ;;  %v32_v9 = vld [vmem:[#allocation3] sm:$0xff]  ;;  %v200_v23 = vmov 1983009808   ;;  %vm117_vm1 = vcmask 1041409   ;;  %vm119_vm2 = vcmask 1043459   ;;  %s201_s0 = smov [#allocation6]  }
  0x15   :  { %v35_v1 = vshrl.u32 %v34_v0, 7  ;;  %v50_v13 = vcombine.high %v32_v9, %v32_v9  ;;  %v98_v24 = vunpack.c.l.s4 %v200_v23  ;;  %vm121_vm3 = vcmask 1045509   ;;  %s133_s28 = sshll.u32 %s201_s0, 4  ;;  %s134_s28 = int_to_ptr.vmem [resolvable:$true] %s133_s28 }
  0x16   :  { %vm123_vm4 = vcmask 1047559   ;;  %s171_s29 = scalar_lea.vmem %s134_s28, 64  ;;  %p176_p9 = scmp.lt.s32.totalorder %s134_s28, %s134_s28 }
  0x17   :  { %v43_v2 = vsub.s32 1, %v35_v1  ;;  %v36_v3 = vsub.s32 0, %v35_v1  ;;  %v99_v35 = vunpack.c.0.s8 %v98_v24  ;;  %p172_p8 = scmp.ne.s32.totalorder %s134_s28, %s171_s29  ;;  %p177_p10 = scmp.lt.s32.totalorder %s171_s29, %s171_s29 }
  0x19   :  { %v44_v5 = vrot.slane %v31_v4, %v43_v2  ;;  %v37_v6 = vrot.slane %v31_v4, %v36_v3  ;;  %v102_v45 = vsub.s32 %v99_v35, %v35_v1  ;;  %p178_p11 = por %p177_p10, %p176_p9 }
  0x1b   :  { %46 = vbcast.lane.b32.xlu0 %v44_v5, 256  ;;  %p179_p12 = pnand %p178_p11, %p172_p8 }
  0x1f   :  { %39 = vbcast.lane.b32.xlu0 %v37_v6, 256 }
  0x8d   :  { %v47_v10 = vpop.permute.xlu0 %46 }
  0x8e   :  { %v56_v11 = vmul.f32 %v47_v10, %v33_v7  ;;  %v57_v12 = vmul.f32 %v51_v8, %v47_v10 }
  0x90   :  { %v73_v14 = vsel %vm58_vm0, %v56_v11, 0.0  ;;  %v80_v15 = vsel %vm58_vm0, %v57_v12, 0.0 }
  0x91   :  { %v74_v16 = vrot.slane %v73_v14, 4  ;;  %v81_v17 = vrot.slane %v80_v15, 4  ;;  %v40_v18 = vpop.permute.xlu0 %39 }
  0x92   :  { %v54_v19 = vmul.f32 %v40_v18, %v32_v9  ;;  %v55_v20 = vmul.f32 %v50_v13, %v40_v18 }
  0x93   :  { %v75_v21 = vadd.f32 %v74_v16, %v73_v14  ;;  %v82_v22 = vadd.f32 %v81_v17, %v80_v15 }
  0x94   :  { %v59_v25 = vsel %vm58_vm0, %v54_v19, 0.0  ;;  %v66_v26 = vsel %vm58_vm0, %v55_v20, 0.0 }
  0x95   :  { %v76_v27 = vrot.slane %v75_v21, 2  ;;  %v83_v28 = vrot.slane %v82_v22, 2  ;;  %v60_v29 = vrot.slane %v59_v25, 4  ;;  %v67_v30 = vrot.slane %v66_v26, 4 }
  0x97   :  { %v77_v31 = vadd.f32 %v76_v27, %v75_v21  ;;  %v84_v32 = vadd.f32 %v83_v28, %v82_v22  ;;  %v61_v33 = vadd.f32 %v60_v29, %v59_v25  ;;  %v68_v34 = vadd.f32 %v67_v30, %v66_v26 }
  0x99   :  { %v78_v36 = vrot.slane %v77_v31, 1  ;;  %v85_v37 = vrot.slane %v84_v32, 1  ;;  %v62_v38 = vrot.slane %v61_v33, 2  ;;  %v69_v39 = vrot.slane %v68_v34, 2 }
  0x9b   :  { %v79_v41 = vadd.f32 %v78_v36, %v77_v31  ;;  %v86_v42 = vadd.f32 %v85_v37, %v84_v32  ;;  %v63_v43 = vadd.f32 %v62_v38, %v61_v33  ;;  %v70_v44 = vadd.f32 %v69_v39, %v68_v34 }
  0x9d   :  { %v90_v46 = vadd.f32 %v87_v40, %v79_v41  ;;  %v91_v47 = vadd.f32 %v87_v40, %v86_v42  ;;  %v64_v48 = vrot.slane %v63_v43, 1  ;;  %v71_v49 = vrot.slane %v70_v44, 1 }
  0x9f   :  { %v104_v50 = vcombine.low %v90_v46, %v91_v47  ;;  %v65_v51 = vadd.f32 %v64_v48, %v63_v43  ;;  %v72_v52 = vadd.f32 %v71_v49, %v70_v44 }
  0xa1   :  { %v88_v53 = vadd.f32 %v87_v40, %v65_v51  ;;  %v89_v54 = vadd.f32 %v87_v40, %v72_v52  ;;  %v111_v55 = vrot.slane %v104_v50, %v102_v45 }
  0xa3   :  { %v96_v56 = vcombine.low %v88_v53, %v89_v54  ;;  %v116_v58 = vrot.slane %v111_v55, 7 }
  0xa5   :  { %v103_v57 = vrot.slane %v96_v56, %v102_v45 }
  0xa7   :  { %v118_v59 = vsel %vm117_vm1, %v116_v58, %v103_v57 }
  0xa8   :  { %v120_v60 = vsel %vm119_vm2, %v116_v58, %v118_v59 }
  0xa9   :  { %v122_v61 = vsel %vm121_vm3, %v116_v58, %v120_v60 }
  0xaa   :  { %v124_v62 = vsel %vm123_vm4, %v116_v58, %v122_v61 }
  0xab   :  { %126 = vst [vmem:[#allocation6] sm:$0xf] %v124_v62 }
  0xac   :  { %182 = shalt.err (!%p179_p12)
}
  0xad   :  { %s183_s5 = scalar_lea.hbm %s259_s3, 64 }
  0xae   :  { %p184_p13 = scmp.ne.s32.totalorder %s259_s3, %s183_s5  ;;  %p187_p0 = scmp.lt.u32.totalorder %s183_s5, %s259_s3 }
  0xb0   :  { %p189_p1 = pnand %p187_p0, %p184_p13 }
  0xb2   :  { %192 = shalt.err (!%p189_p1)
}
  0xb3   :  { %136 = dma.vmem_to_hbm [thread:$0]  %s134_s28, 64, %s259_s3, [#allocation5]  }
  0xb4   :  { %195 = dma.done.wait [#allocation5], 64  }
  0xb5   :  { %196 = vsyncadd [#allocation5], 4294967232 }
  0xb6   :  { %140 = vsyncpa [#allocation4], 1 }
  0xb7   :  { %141 = vsyncpa [#allocation5], 1 }

</bundles_post_ra>
